<compile_context>
chip_gen: v7x
topology: tpu7x:2x2x1
jax: 0.10.0
libtpu: 0.0.40
codegen_flags: <defaults>
</compile_context>

<pallas_src>
import jax
import jax.numpy as jnp
from jax.experimental import pallas as pl
from jax.experimental.pallas import tpu as pltpu

PARTICLE_SIZE = 2
N_HIDDEN = 1
N_FEATURES = 64
RAND_FEATURES = 64
EST_BOUNDS = 1.0


def pairwise_sampler_kernel(x_ref, w1_ref, b1_ref, wh_ref, bh_ref,
                            wout_ref, bout_ref, o_ref):
    # Everything is transposed: features on sublanes, samples on lanes.
    # x_ref: (RAND_FEATURES, TILE_N)
    h = jnp.dot(w1_ref[...], x_ref[...], preferred_element_type=jnp.float32)
    h = jnp.maximum(h + b1_ref[...], 0.0)                    # (N_FEATURES, TILE_N)

    for l in range(N_HIDDEN):
        h = jnp.dot(wh_ref[l], h, preferred_element_type=jnp.float32)
        h = jnp.maximum(h + bh_ref[l], 0.0)

    # Output layer: (PARTICLE_SIZE, N_FEATURES) @ (N_FEATURES, TILE_N)
    # -> (PARTICLE_SIZE, TILE_N), lane-dense.  est_bounds/2 is pre-folded
    # into wout/bout by the wrapper.
    out = jnp.dot(wout_ref[...], h, preferred_element_type=jnp.float32)
    o_ref[...] = (out + bout_ref[...]).astype(o_ref.dtype)


def _round_up(n, m):
    return (n + m - 1) // m * m


def _choose_grid(n):
    """Pick (tile_n, num_tiles): big lane tiles, >=2 grid steps when possible."""
    n128 = _round_up(max(n, 1), 128)
    if n128 <= 256:
        return n128, 1                                    # tiny input: single tile
    num_tiles = max(2, -(-n128 // 4096))                  # cap tiles at 4096 lanes
    tile = _round_up(-(-n128 // num_tiles), 128)
    return tile, num_tiles


@jax.jit
def pairwise_sampler_mlp(rand, w1, b1, wh, bh, wout, bout):
    """Applies the PairwiseSampler MLP (incl. the *est_bounds/2 scale).

    rand: (N, RAND_FEATURES) float32.  Returns (N, PARTICLE_SIZE).
    """
    N = rand.shape[0]
    tile_n, num_tiles = _choose_grid(N)
    n_pad = tile_n * num_tiles

    # Samples on the lane axis; pad lanes to a tile multiple.
    x_t = jnp.pad(rand.T, ((0, 0), (0, n_pad - N)))       # (RAND_FEATURES, n_pad)

    # Pre-transpose weights (h_new = W^T @ h) and fold the output scale.
    scale = EST_BOUNDS / 2.0
    w1_t = w1.T                                           # (NF, RF)
    b1_c = b1.reshape(N_FEATURES, 1)
    wh_t = jnp.transpose(wh, (0, 2, 1))                   # (NH, NF, NF)
    bh_c = bh.reshape(N_HIDDEN, N_FEATURES, 1)
    wout_t = wout.T * scale                               # (PS, NF)
    bout_c = bout.reshape(PARTICLE_SIZE, 1) * scale

    out_t = pl.pallas_call(
        pairwise_sampler_kernel,
        out_shape=jax.ShapeDtypeStruct((PARTICLE_SIZE, n_pad), rand.dtype),
        grid_spec=pltpu.PrefetchScalarGridSpec(
            num_scalar_prefetch=0,
            grid=(num_tiles,),
            in_specs=[
                pl.BlockSpec((RAND_FEATURES, tile_n), lambda i: (0, i)),      # x^T
                pl.BlockSpec((N_FEATURES, RAND_FEATURES), lambda i: (0, 0)),  # W1^T
                pl.BlockSpec((N_FEATURES, 1), lambda i: (0, 0)),              # b1 column
                pl.BlockSpec((N_HIDDEN, N_FEATURES, N_FEATURES),
                             lambda i: (0, 0, 0)),                            # hidden W^T
                pl.BlockSpec((N_HIDDEN, N_FEATURES, 1),
                             lambda i: (0, 0, 0)),                            # hidden b
                pl.BlockSpec((PARTICLE_SIZE, N_FEATURES), lambda i: (0, 0)),  # Wout^T (scaled)
                pl.BlockSpec((PARTICLE_SIZE, 1), lambda i: (0, 0)),           # bout (scaled)
            ],
            out_specs=pl.BlockSpec((PARTICLE_SIZE, tile_n), lambda i: (0, i)),
        ),
        compiler_params=pltpu.CompilerParams(
            dimension_semantics=("parallel",)),
    )(x_t, w1_t, b1_c, wh_t, bh_c, wout_t, bout_c)

    return out_t[:, :N].T                                  # (N, PARTICLE_SIZE)


def pairwise_sampler(key, num_samples, params):
    """Full forward(num_samples): draw N(0,1) features, run the MLP kernel."""
    # TODO(synk): torch.cuda.FloatTensor(...).normal_() has no bit-exact Pallas
    # equivalent; the standard-normal draw is done with jax.random here.
    rand = jax.random.normal(key, (num_samples, RAND_FEATURES), dtype=jnp.float32)
    return pairwise_sampler_mlp(rand, *params)


def init_params(key):
    """Deterministic params with PyTorch nn.Linear-style uniform init."""
    def linear(k, fan_in, fan_out):
        kw, kb = jax.random.split(k)
        bound = 1.0 / jnp.sqrt(jnp.float32(fan_in))
        w = jax.random.uniform(kw, (fan_in, fan_out), jnp.float32, -bound, bound)
        b = jax.random.uniform(kb, (fan_out,), jnp.float32, -bound, bound)
        return w, b

    keys = jax.random.split(key, 2 + N_HIDDEN)
    w1, b1 = linear(keys[0], RAND_FEATURES, N_FEATURES)
    wh_list, bh_list = [], []
    for l in range(N_HIDDEN):
        w, b = linear(keys[1 + l], N_FEATURES, N_FEATURES)
        wh_list.append(w)
        bh_list.append(b)
    wh = jnp.stack(wh_list, axis=0)                        # (N_HIDDEN, NF, NF)
    bh = jnp.stack(bh_list, axis=0)                        # (N_HIDDEN, NF)
    wout, bout = linear(keys[-1], N_FEATURES, PARTICLE_SIZE)
    return (w1, b1, wh, bh, wout, bout)


def reference(rand, w1, b1, wh, bh, wout, bout):
    h = jnp.maximum(rand @ w1 + b1, 0.0)
    for l in range(N_HIDDEN):
        h = jnp.maximum(h @ wh[l] + bh[l], 0.0)
    return (h @ wout + bout) * EST_BOUNDS / 2.0


if __name__ == "__main__":
    key = jax.random.PRNGKey(0)
    k_param, k_rand = jax.random.split(key)
    params = init_params(k_param)

    # Small batch; deliberately not a multiple of 128 to exercise padding.
    num_samples = 200
    rand = jax.random.normal(k_rand, (num_samples, RAND_FEATURES), dtype=jnp.float32)

    out = pairwise_sampler_mlp(rand, *params)
    out = jax.block_until_ready(out)

    ref = reference(rand, *params)
    assert out.shape == (num_samples, PARTICLE_SIZE)
    assert jnp.allclose(out, ref, atol=1e-5, rtol=1e-5), float(jnp.max(jnp.abs(out - ref)))

    # Also exercise the full forward(num_samples) path (RNG in the wrapper).
    out2 = jax.block_until_ready(pairwise_sampler(k_rand, num_samples, params))
    assert out2.shape == (num_samples, PARTICLE_SIZE)

    print("KERNEL_OK")
</pallas_src>

<mosaic_0001>
module attributes {stable_mosaic.version = 11 : i64} {
  func.func @pairwise_sampler_kernel(%arg0: i32, %arg1: memref<64x256xf32, #tpu.memory_space<vmem>>, %arg2: memref<64x64xf32, #tpu.memory_space<vmem>>, %arg3: memref<64x1xf32, #tpu.memory_space<vmem>>, %arg4: memref<1x64x64xf32, #tpu.memory_space<vmem>>, %arg5: memref<1x64x1xf32, #tpu.memory_space<vmem>>, %arg6: memref<2x64xf32, #tpu.memory_space<vmem>>, %arg7: memref<2x1xf32, #tpu.memory_space<vmem>>, %arg8: memref<2x256xf32, #tpu.memory_space<vmem>>) attributes {dimension_semantics = [#tpu.dimension_semantics<parallel>], iteration_bounds = array<i64: 1>, scalar_prefetch = 0 : i64, scratch_operands = 0 : i64, tpu.core_type = #tpu.core_type<tc>, window_params = [{transform_indices = @transform_0, window_bounds = array<i64: 64, 256>}, {pipeline_mode = #tpu.pipeline_mode<synchronous>, transform_indices = @transform_1, window_bounds = array<i64: 64, 64>}, {pipeline_mode = #tpu.pipeline_mode<synchronous>, transform_indices = @transform_2, window_bounds = array<i64: 64, 1>}, {pipeline_mode = #tpu.pipeline_mode<synchronous>, transform_indices = @transform_3, window_bounds = array<i64: 1, 64, 64>}, {pipeline_mode = #tpu.pipeline_mode<synchronous>, transform_indices = @transform_4, window_bounds = array<i64: 1, 64, 1>}, {pipeline_mode = #tpu.pipeline_mode<synchronous>, transform_indices = @transform_5, window_bounds = array<i64: 2, 64>}, {pipeline_mode = #tpu.pipeline_mode<synchronous>, transform_indices = @transform_6, window_bounds = array<i64: 2, 1>}, {transform_indices = @transform_7, window_bounds = array<i64: 2, 256>}]} {
    %c0 = arith.constant 0 : index
    %c0_0 = arith.constant 0 : index
    %0 = vector.load %arg2[%c0, %c0_0] : memref<64x64xf32, #tpu.memory_space<vmem>>, vector<64x64xf32>
    %c0_1 = arith.constant 0 : index
    %c0_2 = arith.constant 0 : index
    %1 = vector.load %arg1[%c0_1, %c0_2] : memref<64x256xf32, #tpu.memory_space<vmem>>, vector<64x256xf32>
    %cst = arith.constant dense<0.000000e+00> : vector<64x256xf32>
    %2 = tpu.matmul %0, %1, %cst {dimension_numbers = #tpu.dot_dimension_numbers<[1], [0], [0], [1], [0, 0, 1, 1], [], []>} : vector<64x64xf32>, vector<64x256xf32>, vector<64x256xf32> -> vector<64x256xf32>
    %c0_3 = arith.constant 0 : index
    %c0_4 = arith.constant 0 : index
    %3 = vector.load %arg3[%c0_3, %c0_4] : memref<64x1xf32, #tpu.memory_space<vmem>>, vector<64x1xf32>
    %4 = vector.broadcast %3 : vector<64x1xf32> to vector<64x256xf32>
    %5 = arith.addf %2, %4 : vector<64x256xf32>
    %cst_5 = arith.constant 0.000000e+00 : f32
    %6 = vector.broadcast %cst_5 : f32 to vector<64x256xf32>
    %7 = arith.maximumf %5, %6 : vector<64x256xf32>
    %c0_6 = arith.constant 0 : index
    %c0_7 = arith.constant 0 : index
    %c0_8 = arith.constant 0 : index
    %8 = vector.load %arg4[%c0_6, %c0_7, %c0_8] : memref<1x64x64xf32, #tpu.memory_space<vmem>>, vector<1x64x64xf32>
    %9 = vector.shape_cast %8 : vector<1x64x64xf32> to vector<64x64xf32>
    %cst_9 = arith.constant dense<0.000000e+00> : vector<64x256xf32>
    %10 = tpu.matmul %9, %7, %cst_9 {dimension_numbers = #tpu.dot_dimension_numbers<[1], [0], [0], [1], [0, 0, 1, 1], [], []>} : vector<64x64xf32>, vector<64x256xf32>, vector<64x256xf32> -> vector<64x256xf32>
    %c0_10 = arith.constant 0 : index
    %c0_11 = arith.constant 0 : index
    %c0_12 = arith.constant 0 : index
    %11 = vector.load %arg5[%c0_10, %c0_11, %c0_12] : memref<1x64x1xf32, #tpu.memory_space<vmem>>, vector<1x64x1xf32>
    %12 = vector.shape_cast %11 : vector<1x64x1xf32> to vector<64x1xf32>
    %13 = vector.broadcast %12 : vector<64x1xf32> to vector<64x256xf32>
    %14 = arith.addf %10, %13 : vector<64x256xf32>
    %cst_13 = arith.constant 0.000000e+00 : f32
    %15 = vector.broadcast %cst_13 : f32 to vector<64x256xf32>
    %16 = arith.maximumf %14, %15 : vector<64x256xf32>
    %c0_14 = arith.constant 0 : index
    %c0_15 = arith.constant 0 : index
    %17 = vector.load %arg6[%c0_14, %c0_15] : memref<2x64xf32, #tpu.memory_space<vmem>>, vector<2x64xf32>
    %cst_16 = arith.constant dense<0.000000e+00> : vector<2x256xf32>
    %18 = tpu.matmul %17, %16, %cst_16 {dimension_numbers = #tpu.dot_dimension_numbers<[1], [0], [0], [1], [0, 0, 1, 1], [], []>} : vector<2x64xf32>, vector<64x256xf32>, vector<2x256xf32> -> vector<2x256xf32>
    %c0_17 = arith.constant 0 : index
    %c0_18 = arith.constant 0 : index
    %19 = vector.load %arg7[%c0_17, %c0_18] : memref<2x1xf32, #tpu.memory_space<vmem>>, vector<2x1xf32>
    %20 = vector.broadcast %19 : vector<2x1xf32> to vector<2x256xf32>
    %21 = arith.addf %18, %20 : vector<2x256xf32>
    %c0_19 = arith.constant 0 : index
    %c0_20 = arith.constant 0 : index
    %22 = vector.load %arg8[%c0_19, %c0_20] : memref<2x256xf32, #tpu.memory_space<vmem>>, vector<2x256xf32>
    tpu.vector_store %arg8[%c0_19, %c0_20], %21 {strides = array<i32>} : memref<2x256xf32, #tpu.memory_space<vmem>>, vector<2x256xf32>,
    return
  }
  func.func @transform_0(%arg0: i32) -> (i32, i32) {
    %c0_i32 = arith.constant 0 : i32
    %c0_i32_0 = arith.constant 0 : i32
    return %c0_i32, %arg0 : i32, i32
  }
  func.func @transform_1(%arg0: i32) -> (i32, i32) {
    %c0_i32 = arith.constant 0 : i32
    %c0_i32_0 = arith.constant 0 : i32
    %c0_i32_1 = arith.constant 0 : i32
    return %c0_i32, %c0_i32_0 : i32, i32
  }
  func.func @transform_2(%arg0: i32) -> (i32, i32) {
    %c0_i32 = arith.constant 0 : i32
    %c0_i32_0 = arith.constant 0 : i32
    %c0_i32_1 = arith.constant 0 : i32
    return %c0_i32, %c0_i32_0 : i32, i32
  }
  func.func @transform_3(%arg0: i32) -> (i32, i32, i32) {
    %c0_i32 = arith.constant 0 : i32
    %c0_i32_0 = arith.constant 0 : i32
    %c0_i32_1 = arith.constant 0 : i32
    %c0_i32_2 = arith.constant 0 : i32
    return %c0_i32, %c0_i32_0, %c0_i32_1 : i32, i32, i32
  }
  func.func @transform_4(%arg0: i32) -> (i32, i32, i32) {
    %c0_i32 = arith.constant 0 : i32
    %c0_i32_0 = arith.constant 0 : i32
    %c0_i32_1 = arith.constant 0 : i32
    %c0_i32_2 = arith.constant 0 : i32
    return %c0_i32, %c0_i32_0, %c0_i32_1 : i32, i32, i32
  }
  func.func @transform_5(%arg0: i32) -> (i32, i32) {
    %c0_i32 = arith.constant 0 : i32
    %c0_i32_0 = arith.constant 0 : i32
    %c0_i32_1 = arith.constant 0 : i32
    return %c0_i32, %c0_i32_0 : i32, i32
  }
  func.func @transform_6(%arg0: i32) -> (i32, i32) {
    %c0_i32 = arith.constant 0 : i32
    %c0_i32_0 = arith.constant 0 : i32
    %c0_i32_1 = arith.constant 0 : i32
    return %c0_i32, %c0_i32_0 : i32, i32
  }
  func.func @transform_7(%arg0: i32) -> (i32, i32) {
    %c0_i32 = arith.constant 0 : i32
    %c0_i32_0 = arith.constant 0 : i32
    return %c0_i32, %arg0 : i32, i32
  }
}

</mosaic_0001>

<bundles_post_ra>
// kernel: pairwise_sampler_mlp.1
= control target key start
LH: loop header
LB: loop body
LE: loop exit
PB: predicated region body
PF: predicated region fallthrough
CT: control target
= control target key end

     0   :  { %v628_v3 = vmov 0.0   ;;  %v629_v4 = vmov 0   ;;  %vm98_vm0 = vcmask 523264   ;;  %s857_s0 = inlined_call_operand.vmem [shape: f32[64,256], index: 0, kind: input, shape index: {}]   ;;  %s858_s2 = inlined_call_operand.vmem [shape: f32[64,1], index: 2, kind: input, shape index: {}]   ;;  %s859_s1 = inlined_call_operand.vmem [shape: f32[64,64], index: 1, kind: input, shape index: {}]   ;;  %s860_s4 = inlined_call_operand.vmem [shape: f32[1,64,1], index: 4, kind: input, shape index: {}]   ;;  %s861_s6 = inlined_call_operand.vmem [shape: f32[2,1], index: 6, kind: input, shape index: {}]   ;;  %s862_s3 = inlined_call_operand.vmem [shape: f32[1,64,64], index: 3, kind: input, shape index: {}]   ;;  %s863_s5 = inlined_call_operand.vmem [shape: f32[2,64], index: 5, kind: input, shape index: {}]   ;;  %s864_s7 = inlined_call_operand.vmem [shape: f32[2,256], index: 7, kind: output, shape index: {}]  }
   0x1   :  { %v35_v0 = vld [vmem:[%s857_s0 + $0x8] sm:$0xff]  ;;  %v37_v1 = vld [vmem:[%s857_s0 + $0x18] sm:$0xff]  ;;  %v34_v2 = vld [vmem:[%s857_s0] sm:$0xff]  ;;  %187 = vmatprep.mubr.f32.mxu0 %v628_v3  ;;  %626 = vset.pattern.permute.xlu0 %v629_v4 }
   0x2   :  { %v576_v5 = vpack.c.bf16 %v37_v1, %v35_v0  ;;  %v36_v6 = vld [vmem:[%s857_s0 + $0x10] sm:$0xff]  ;;  %v39_v7 = vld [vmem:[%s857_s0 + $0x28] sm:$0xff]  ;;  %v41_v8 = vld [vmem:[%s857_s0 + $0x38] sm:$0xff]  ;;  %627 = vset.pattern.permute.xlu1 %v629_v4  ;;  %396 = vmatprep.mubr.f32.mxu1 %v628_v3 }
   0x3   :  { %v578_v9 = vpack.c.bf16 %v36_v6, %v34_v2  ;;  %v580_v10 = vpack.c.bf16 %v41_v8, %v39_v7  ;;  %v38_v11 = vld [vmem:[%s857_s0 + $0x20] sm:$0xff]  ;;  %v40_v12 = vld [vmem:[%s857_s0 + $0x30] sm:$0xff]  ;;  %v43_v13 = vld [vmem:[%s857_s0 + $0x48] sm:$0xff] }
   0x4   :  { %577 = vmatprep.subr.bf16.mxu0 %v576_v5  ;;  %v45_v14 = vld [vmem:[%s857_s0 + $0x58] sm:$0xff]  ;;  %v582_v15 = vpack.c.bf16 %v40_v12, %v38_v11  ;;  %v42_v17 = vld [vmem:[%s857_s0 + $0x40] sm:$0xff]  ;;  %v44_v18 = vld [vmem:[%s857_s0 + $0x50] sm:$0xff] }
   0x5   :  { %579 = vmatpush1.bf16.msra.mxu0 %v578_v9  ;;  %v584_v16 = vpack.c.bf16 %v45_v14, %v43_v13  ;;  %v47_v19 = vld [vmem:[%s857_s0 + $0x68] sm:$0xff]  ;;  %v49_v20 = vld [vmem:[%s857_s0 + $0x78] sm:$0xff]  ;;  %v586_v21 = vpack.c.bf16 %v44_v18, %v42_v17  ;;  %v50_v22 = vld [vmem:[%s858_s2] sm:$0xff] }
   0x6   :  { %581 = vmatprep.subr.bf16.mxu0 %v580_v10  ;;  %v52_v23 = vld [vmem:[%s858_s2 + $0x10] sm:$0xff]  ;;  %v588_v24 = vpack.c.bf16 %v49_v20, %v47_v19  ;;  %v46_v25 = vld [vmem:[%s857_s0 + $0x60] sm:$0xff]  ;;  %60 = vperm.xlu0 %626, %v50_v22   ;;  %v51_v27 = vld [vmem:[%s858_s2 + $0x8] sm:$0xff] }
   0x7   :  { %v48_v26 = vld [vmem:[%s857_s0 + $0x70] sm:$0xff]  ;;  %70 = vperm.xlu1 %627, %v52_v23   ;;  %v53_v28 = vld [vmem:[%s858_s2 + $0x18] sm:$0xff]  ;;  %v54_v30 = vld [vmem:[%s858_s2 + $0x20] sm:$0xff] }
   0x8   :  { %v590_v29 = vpack.c.bf16 %v48_v26, %v46_v25  ;;  %v55_v31 = vld [vmem:[%s858_s2 + $0x28] sm:$0xff]  ;;  %v26_v32 = vld [vmem:[%s859_s1] sm:$0xff]  ;;  %v56_v33 = vld [vmem:[%s858_s2 + $0x30] sm:$0xff] }
   0x9   :  { %583 = vmatpush1.bf16.msra.mxu0 %v582_v15  ;;  %v57_v34 = vld [vmem:[%s858_s2 + $0x38] sm:$0xff]  ;;  %v27_v35 = vld [vmem:[%s859_s1 + $0x8] sm:$0xff]  ;;  %v260_v36 = vld [vmem:[%s860_s4] sm:$0xff] }
   0xa   :  { %585 = vmatprep.subr.bf16.mxu0 %v584_v16  ;;  %65 = vperm.xlu0 %626, %v51_v27   ;;  %v261_v37 = vld [vmem:[%s860_s4 + $0x8] sm:$0xff]  ;;  %v28_v38 = vld [vmem:[%s859_s1 + $0x10] sm:$0xff]  ;;  %v263_v40 = vld [vmem:[%s860_s4 + $0x18] sm:$0xff] }
   0xb   :  { %75 = vperm.xlu1 %627, %v53_v28   ;;  %v262_v39 = vld [vmem:[%s860_s4 + $0x10] sm:$0xff]  ;;  %v29_v41 = vld [vmem:[%s859_s1 + $0x18] sm:$0xff]  ;;  %v264_v42 = vld [vmem:[%s860_s4 + $0x20] sm:$0xff] }
   0xc   :  { %v265_v43 = vld [vmem:[%s860_s4 + $0x28] sm:$0xff]  ;;  %v30_v44 = vld [vmem:[%s859_s1 + $0x20] sm:$0xff]  ;;  %v266_v45 = vld [vmem:[%s860_s4 + $0x30] sm:$0xff] }
   0xd   :  { %587 = vmatpush1.bf16.msra.mxu0 %v586_v21  ;;  %v267_v46 = vld [vmem:[%s860_s4 + $0x38] sm:$0xff]  ;;  %v31_v47 = vld [vmem:[%s859_s1 + $0x28] sm:$0xff]  ;;  %v462_v48 = vld [vmem:[%s861_s6] sm:$0x3] }
   0xe   :  { %589 = vmatprep.subr.bf16.mxu0 %v588_v24  ;;  %80 = vperm.xlu0 %626, %v54_v30   ;;  %v32_v49 = vld [vmem:[%s859_s1 + $0x30] sm:$0xff]  ;;  %v33_v50 = vld [vmem:[%s859_s1 + $0x38] sm:$0xff] }
   0xf   :  { %85 = vperm.xlu1 %627, %v55_v31  }
  0x11   :  { %591 = vmatpush1.bf16.msra.mxu0 %v590_v29 }
  0x12   :  { %90 = vperm.xlu0 %626, %v56_v33  }
  0x13   :  { %95 = vperm.xlu1 %627, %v57_v34  }
  0x14   :  { %558 = vmatmul.mubr.msk.f32.vlgmr.msra.gmra.mrb[0].mxu0 %vm98_vm0, %v26_v32 }
  0x15   :  { %193 = vmatprep.mubr.f32.mxu0 %v628_v3 }
  0x16   :  { %270 = vperm.xlu0 %626, %v260_v36  }
  0x17   :  { %275 = vperm.xlu1 %627, %v261_v37  }
  0x18   :  { %559 = vmatmul.mubr.msk.f32.gmra.mrb[2].mxu0 %vm98_vm0, %v27_v35 }
  0x19   :  { %199 = vmatprep.mubr.f32.mxu0 %v628_v3 }
  0x1a   :  { %280 = vperm.xlu0 %626, %v262_v39  }
  0x1b   :  { %285 = vperm.xlu1 %627, %v263_v40  }
  0x1c   :  { %560 = vmatmul.mubr.msk.f32.gmra.mrb[4].mxu0 %vm98_vm0, %v28_v38 }
  0x1d   :  { %205 = vmatprep.mubr.f32.mxu0 %v628_v3 }
  0x1e   :  { %290 = vperm.xlu0 %626, %v264_v42  }
  0x1f   :  { %295 = vperm.xlu1 %627, %v265_v43  }
  0x20   :  { %561 = vmatmul.mubr.msk.f32.gmra.mrb[6].mxu0 %vm98_vm0, %v29_v41 }
  0x21   :  { %211 = vmatprep.mubr.f32.mxu0 %v628_v3 }
  0x22   :  { %300 = vperm.xlu0 %626, %v266_v45  }
  0x23   :  { %305 = vperm.xlu1 %627, %v267_v46  }
  0x24   :  { %562 = vmatmul.mubr.msk.f32.gmra.mrb[8].mxu0 %vm98_vm0, %v30_v44 }
  0x25   :  { %217 = vmatprep.mubr.f32.mxu0 %v628_v3 }
  0x26   :  { %465 = vperm.xlu0 %626, %v462_v48  }
  0x28   :  { %563 = vmatmul.mubr.msk.f32.gmra.mrb[10].mxu0 %vm98_vm0, %v31_v47 }
  0x29   :  { %223 = vmatprep.mubr.f32.mxu0 %v628_v3 }
  0x2c   :  { %564 = vmatmul.mubr.msk.f32.gmra.mrb[12].mxu0 %vm98_vm0, %v32_v49 }
  0x2d   :  { %229 = vmatprep.mubr.f32.mxu0 %v628_v3 }
  0x30   :  { %565 = vmatmul.mubr.msk.f32.gmra.mrb[14].mxu0 %vm98_vm0, %v33_v50 }
  0x31   :  { %535 = vmatprep.mubr.f32.mxu0 %v628_v3 }
  0x85   :  { %v61_v51 = vpop.permute.xlu0 %60 }
  0x86   :  { %v71_v60 = vpop.permute.xlu1 %70 }
  0x89   :  { %v66_v55 = vpop.permute.xlu0 %65 }
  0x8a   :  { %v76_v8 = vpop.permute.xlu1 %75 }
  0x8d   :  { %v81_v21 = vpop.permute.xlu0 %80 }
  0x8e   :  { %v86_v24 = vpop.permute.xlu1 %85 }
  0x91   :  { %v91_v37 = vpop.permute.xlu0 %90 }
  0x92   :  { %v96_v40 = vpop.permute.xlu1 %95 }
  0xe7   :  { %v189_v52 = vpop.f32.mrb[0].mxu0 }
  0xe8   :  { %v191_v53 = vpop.f32.mrb[1].mxu0  ;;  %v190_v54 = vadd.f32 %v189_v52, %v61_v51  ;;  %v252_v52 = vld [vmem:[%s862_s3] sm:$0xff] }
  0xe9   :  { %v192_v56 = vadd.f32 %v191_v53, %v61_v51  ;;  %v253_v53 = vld [vmem:[%s862_s3 + $0x8] sm:$0xff] }
  0xea   :  { %v236_v62 = vmax.f32 %v190_v54, 0.0  ;;  %v254_v54 = vld [vmem:[%s862_s3 + $0x10] sm:$0xff] }
  0xeb   :  { %v195_v57 = vpop.f32.mrb[2].mxu0  ;;  %v237_v0 = vmax.f32 %v192_v56, 0.0  ;;  %v256_v56 = vld [vmem:[%s862_s3 + $0x20] sm:$0xff] }
  0xec   :  { %v196_v58 = vadd.f32 %v195_v57, %v66_v55  ;;  %v197_v59 = vpop.f32.mrb[3].mxu0  ;;  %v257_v57 = vld [vmem:[%s862_s3 + $0x28] sm:$0xff] }
  0xed   :  { %v198_v61 = vadd.f32 %v197_v59, %v66_v55  ;;  %v255_v55 = vld [vmem:[%s862_s3 + $0x18] sm:$0xff] }
  0xee   :  { %v238_v63 = vmax.f32 %v196_v58, 0.0  ;;  %v258_v58 = vld [vmem:[%s862_s3 + $0x30] sm:$0xff]  ;;  %v259_v59 = vld [vmem:[%s862_s3 + $0x38] sm:$0xff] }
  0xef   :  { %v239_v1 = vmax.f32 %v198_v61, 0.0  ;;  %v201_v2 = vpop.f32.mrb[4].mxu0 }
  0xf0   :  { %v203_v4 = vpop.f32.mrb[5].mxu0  ;;  %v594_v5 = vpack.c.bf16 %v238_v63, %v236_v62  ;;  %v202_v7 = vadd.f32 %v201_v2, %v71_v60  ;;  %v271_v62 = vpop.permute.xlu0 %270 }
  0xf1   :  { %v592_v6 = vpack.c.bf16 %v239_v1, %v237_v0  ;;  %v204_v9 = vadd.f32 %v203_v4, %v71_v60  ;;  %v276_v0 = vpop.permute.xlu1 %275 }
  0xf2   :  { %v240_v14 = vmax.f32 %v202_v7, 0.0 }
  0xf3   :  { %v207_v10 = vpop.f32.mrb[6].mxu0  ;;  %593 = vmatprep.subr.bf16.mxu1 %v592_v6  ;;  %v241_v16 = vmax.f32 %v204_v9, 0.0 }
  0xf4   :  { %v208_v11 = vadd.f32 %v207_v10, %v76_v8  ;;  %v209_v12 = vpop.f32.mrb[7].mxu0  ;;  %595 = vmatpush1.bf16.msra.mxu1 %v594_v5 }
  0xf5   :  { %v210_v13 = vadd.f32 %v209_v12, %v76_v8 }
  0xf6   :  { %v242_v15 = vmax.f32 %v208_v11, 0.0 }
  0xf7   :  { %v243_v17 = vmax.f32 %v210_v13, 0.0  ;;  %v213_v18 = vpop.f32.mrb[8].mxu0  ;;  %v281_v13 = vpop.permute.xlu0 %280 }
  0xf8   :  { %v598_v19 = vpack.c.bf16 %v242_v15, %v240_v14  ;;  %v215_v20 = vpop.f32.mrb[9].mxu0  ;;  %v214_v23 = vadd.f32 %v213_v18, %v81_v21 }
  0xf9   :  { %v596_v22 = vpack.c.bf16 %v243_v17, %v241_v16  ;;  %v216_v25 = vadd.f32 %v215_v20, %v81_v21  ;;  %v286_v16 = vpop.permute.xlu1 %285 }
  0xfa   :  { %v244_v30 = vmax.f32 %v214_v23, 0.0 }
  0xfb   :  { %v219_v26 = vpop.f32.mrb[10].mxu0  ;;  %597 = vmatprep.subr.bf16.mxu1 %v596_v22  ;;  %v245_v32 = vmax.f32 %v216_v25, 0.0 }
  0xfc   :  { %v220_v27 = vadd.f32 %v219_v26, %v86_v24  ;;  %v221_v28 = vpop.f32.mrb[11].mxu0  ;;  %599 = vmatpush1.bf16.msra.mxu1 %v598_v19 }
  0xfd   :  { %v222_v29 = vadd.f32 %v221_v28, %v86_v24 }
  0xfe   :  { %v246_v31 = vmax.f32 %v220_v27, 0.0 }
  0xff   :  { %v247_v33 = vmax.f32 %v222_v29, 0.0  ;;  %v225_v34 = vpop.f32.mrb[12].mxu0  ;;  %v291_v29 = vpop.permute.xlu0 %290 }
 0x100   :  { %v602_v35 = vpack.c.bf16 %v246_v31, %v244_v30  ;;  %v227_v36 = vpop.f32.mrb[13].mxu0  ;;  %v226_v39 = vadd.f32 %v225_v34, %v91_v37 }
 0x101   :  { %v600_v38 = vpack.c.bf16 %v247_v33, %v245_v32  ;;  %v228_v41 = vadd.f32 %v227_v36, %v91_v37  ;;  %v296_v32 = vpop.permute.xlu1 %295 }
 0x102   :  { %v248_v46 = vmax.f32 %v226_v39, 0.0 }
 0x103   :  { %v231_v42 = vpop.f32.mrb[14].mxu0  ;;  %601 = vmatprep.subr.bf16.mxu1 %v600_v38  ;;  %v249_v48 = vmax.f32 %v228_v41, 0.0 }
 0x104   :  { %v232_v43 = vadd.f32 %v231_v42, %v96_v40  ;;  %v233_v44 = vpop.f32.mrb[15].mxu0  ;;  %603 = vmatpush1.bf16.msra.mxu1 %v602_v35 }
 0x105   :  { %v234_v45 = vadd.f32 %v233_v44, %v96_v40 }
 0x106   :  { %v250_v47 = vmax.f32 %v232_v43, 0.0 }
 0x107   :  { %v251_v49 = vmax.f32 %v234_v45, 0.0  ;;  %v301_v45 = vpop.permute.xlu0 %300 }
 0x108   :  { %v606_v50 = vpack.c.bf16 %v250_v47, %v248_v46 }
 0x109   :  { %v604_v51 = vpack.c.bf16 %v251_v49, %v249_v48  ;;  %v306_v48 = vpop.permute.xlu1 %305 }
 0x10b   :  { %605 = vmatprep.subr.bf16.mxu1 %v604_v51 }
 0x10c   :  { %607 = vmatpush1.bf16.msra.mxu1 %v606_v50 }
 0x10f   :  { %566 = vmatmul.mubr.msk.f32.vlgmr.msra.gmra.mrb[0].mxu1 %vm98_vm0, %v252_v52 }
 0x110   :  { %402 = vmatprep.mubr.f32.mxu1 %v628_v3 }
 0x113   :  { %567 = vmatmul.mubr.msk.f32.gmra.mrb[2].mxu1 %vm98_vm0, %v253_v53 }
 0x114   :  { %408 = vmatprep.mubr.f32.mxu1 %v628_v3 }
 0x117   :  { %568 = vmatmul.mubr.msk.f32.gmra.mrb[4].mxu1 %vm98_vm0, %v254_v54 }
 0x118   :  { %414 = vmatprep.mubr.f32.mxu1 %v628_v3 }
 0x11b   :  { %569 = vmatmul.mubr.msk.f32.gmra.mrb[6].mxu1 %vm98_vm0, %v255_v55 }
 0x11c   :  { %420 = vmatprep.mubr.f32.mxu1 %v628_v3 }
 0x11f   :  { %570 = vmatmul.mubr.msk.f32.gmra.mrb[8].mxu1 %vm98_vm0, %v256_v56 }
 0x120   :  { %426 = vmatprep.mubr.f32.mxu1 %v628_v3 }
 0x123   :  { %571 = vmatmul.mubr.msk.f32.gmra.mrb[10].mxu1 %vm98_vm0, %v257_v57 }
 0x124   :  { %432 = vmatprep.mubr.f32.mxu1 %v628_v3 }
 0x127   :  { %572 = vmatmul.mubr.msk.f32.gmra.mrb[12].mxu1 %vm98_vm0, %v258_v58 }
 0x128   :  { %438 = vmatprep.mubr.f32.mxu1 %v628_v3 }
 0x12b   :  { %573 = vmatmul.mubr.msk.f32.gmra.mrb[14].mxu1 %vm98_vm0, %v259_v59 }
 0x1e2   :  { %v398_v60 = vpop.f32.mrb[0].mxu1 }
 0x1e3   :  { %v400_v61 = vpop.f32.mrb[1].mxu1  ;;  %v399_v63 = vadd.f32 %v398_v60, %v271_v62  ;;  %v461_v60 = vld [vmem:[%s863_s5] sm:$0x3] }
 0x1e4   :  { %v401_v1 = vadd.f32 %v400_v61, %v271_v62  ;;  %v466_v61 = vpop.permute.xlu0 %465 }
 0x1e5   :  { %v445_v7 = vmax.f32 %v399_v63, 0.0 }
 0x1e6   :  { %v404_v2 = vpop.f32.mrb[2].mxu1  ;;  %v446_v9 = vmax.f32 %v401_v1, 0.0 }
 0x1e7   :  { %v405_v4 = vadd.f32 %v404_v2, %v276_v0  ;;  %v406_v5 = vpop.f32.mrb[3].mxu1 }
 0x1e8   :  { %v407_v6 = vadd.f32 %v406_v5, %v276_v0 }
 0x1e9   :  { %v447_v8 = vmax.f32 %v405_v4, 0.0 }
 0x1ea   :  { %v448_v3 = vmax.f32 %v407_v6, 0.0  ;;  %v410_v10 = vpop.f32.mrb[4].mxu1 }
 0x1eb   :  { %v610_v11 = vpack.c.bf16 %v447_v8, %v445_v7  ;;  %v412_v12 = vpop.f32.mrb[5].mxu1  ;;  %v411_v15 = vadd.f32 %v410_v10, %v281_v13 }
 0x1ec   :  { %v608_v14 = vpack.c.bf16 %v448_v3, %v446_v9  ;;  %v413_v17 = vadd.f32 %v412_v12, %v281_v13 }
 0x1ed   :  { %v449_v22 = vmax.f32 %v411_v15, 0.0 }
 0x1ee   :  { %v416_v18 = vpop.f32.mrb[6].mxu1  ;;  %609 = vmatprep.subr.bf16.mxu0 %v608_v14  ;;  %v450_v24 = vmax.f32 %v413_v17, 0.0 }
 0x1ef   :  { %v417_v19 = vadd.f32 %v416_v18, %v286_v16  ;;  %v418_v20 = vpop.f32.mrb[7].mxu1  ;;  %611 = vmatpush1.bf16.msra.mxu0 %v610_v11 }
 0x1f0   :  { %v419_v21 = vadd.f32 %v418_v20, %v286_v16 }
 0x1f1   :  { %v451_v23 = vmax.f32 %v417_v19, 0.0 }
 0x1f2   :  { %v452_v25 = vmax.f32 %v419_v21, 0.0  ;;  %v422_v26 = vpop.f32.mrb[8].mxu1 }
 0x1f3   :  { %v614_v27 = vpack.c.bf16 %v451_v23, %v449_v22  ;;  %v424_v28 = vpop.f32.mrb[9].mxu1  ;;  %v423_v31 = vadd.f32 %v422_v26, %v291_v29 }
 0x1f4   :  { %v612_v30 = vpack.c.bf16 %v452_v25, %v450_v24  ;;  %v425_v33 = vadd.f32 %v424_v28, %v291_v29 }
 0x1f5   :  { %v453_v38 = vmax.f32 %v423_v31, 0.0 }
 0x1f6   :  { %v428_v34 = vpop.f32.mrb[10].mxu1  ;;  %613 = vmatprep.subr.bf16.mxu0 %v612_v30  ;;  %v454_v40 = vmax.f32 %v425_v33, 0.0 }
 0x1f7   :  { %v429_v35 = vadd.f32 %v428_v34, %v296_v32  ;;  %v430_v36 = vpop.f32.mrb[11].mxu1  ;;  %615 = vmatpush1.bf16.msra.mxu0 %v614_v27 }
 0x1f8   :  { %v431_v37 = vadd.f32 %v430_v36, %v296_v32 }
 0x1f9   :  { %v455_v39 = vmax.f32 %v429_v35, 0.0 }
 0x1fa   :  { %v456_v41 = vmax.f32 %v431_v37, 0.0  ;;  %v434_v42 = vpop.f32.mrb[12].mxu1 }
 0x1fb   :  { %v618_v43 = vpack.c.bf16 %v455_v39, %v453_v38  ;;  %v436_v44 = vpop.f32.mrb[13].mxu1  ;;  %v435_v47 = vadd.f32 %v434_v42, %v301_v45 }
 0x1fc   :  { %v616_v46 = vpack.c.bf16 %v456_v41, %v454_v40  ;;  %v437_v49 = vadd.f32 %v436_v44, %v301_v45 }
 0x1fd   :  { %v457_v54 = vmax.f32 %v435_v47, 0.0 }
 0x1fe   :  { %v440_v50 = vpop.f32.mrb[14].mxu1  ;;  %617 = vmatprep.subr.bf16.mxu0 %v616_v46  ;;  %v458_v56 = vmax.f32 %v437_v49, 0.0 }
 0x1ff   :  { %v441_v51 = vadd.f32 %v440_v50, %v306_v48  ;;  %v442_v52 = vpop.f32.mrb[15].mxu1  ;;  %619 = vmatpush1.bf16.msra.mxu0 %v618_v43 }
 0x200   :  { %v443_v53 = vadd.f32 %v442_v52, %v306_v48 }
 0x201   :  { %v459_v55 = vmax.f32 %v441_v51, 0.0 }
 0x202   :  { %v460_v57 = vmax.f32 %v443_v53, 0.0 }
 0x203   :  { %v622_v58 = vpack.c.bf16 %v459_v55, %v457_v54 }
 0x204   :  { %v620_v59 = vpack.c.bf16 %v460_v57, %v458_v56 }
 0x206   :  { %621 = vmatprep.subr.bf16.mxu0 %v620_v59 }
 0x207   :  { %623 = vmatpush1.bf16.msra.mxu0 %v622_v58 }
 0x20a   :  { %574 = vmatmul.mubr.msk.f32.vlgmr.msra.gmra.mrb[16].mxu0 %vm98_vm0, %v461_v60 }
 0x2dd   :  { %v537_v62 = vpop.f32.mrb[16].mxu0 }
 0x2de   :  { %v538_v63 = vadd.f32 %v537_v62, %v466_v61  ;;  %v539_v0 = vpop.f32.mrb[17].mxu0 }
 0x2df   :  { %v540_v1 = vadd.f32 %v539_v0, %v466_v61 }
 0x2e1   :  { %v544_v2 = vcombine.low %v538_v63, %v540_v1 }
 0x2e3   :  { %575 = vst.sshfl [vmem:[%s864_s7] sm:$0x33 pattern:$0x76325410] %v544_v2 }

</bundles_post_ra>
